<compile_context>
chip_gen: v6e
topology: v6e:2x2x1
jax: 0.10.0
libtpu: 0.0.40
codegen_flags: <defaults>
</compile_context>

<pallas_src>
import jax
import jax.numpy as jnp
from jax import lax
from jax.experimental import pallas as pl
from jax.experimental.pallas import tpu as pltpu

SUBLANES = 8
VMEM_LIMIT = 32 * 1024 * 1024  # explicit scoped-VMEM cap: safe on v5e/v6e (128 MiB) and v7x (64 MiB)


# ------------------- fused Conv1d + BatchNorm1d stack (im2col) -------------------
def _make_conv_stack_kernel(channels, K, T):
    n_layers = len(channels) - 1
    pad = K // 2

    def kernel(x_ref, *rest):
        o_ref, pb_ref, col_ref = rest[-3:]
        wsb = rest[:-3]
        # Zero once per batch item: only the 'same'-padding halo rows are read un-written.
        pb_ref[...] = jnp.zeros(pb_ref.shape, pb_ref.dtype)
        cur = x_ref[0]                                            # (T, C0) f32
        for l in range(n_layers):
            cin = channels[l]
            w_ref, sc_ref, bi_ref = wsb[3 * l], wsb[3 * l + 1], wsb[3 * l + 2]
            # Place the current activation in the middle of the zero-padded buffer.
            pb_ref[pl.ds(pad, T), 0:cin] = cur
            # im2col: conv becomes ONE MXU dot with a K*cin contraction dimension.
            for k in range(K):
                col_ref[:, k * cin:(k + 1) * cin] = pb_ref[pl.ds(k, T), 0:cin]
            y = jnp.dot(col_ref[:, 0:K * cin].astype(jnp.bfloat16), w_ref[...],
                        preferred_element_type=jnp.float32)
            # Fused BatchNorm (inference affine): y * scale + bias.
            cur = y * sc_ref[...] + bi_ref[...]
        o_ref[0] = cur

    return kernel


def conv_stack(x, conv_params, kernel_size):
    B, T, C0 = x.shape
    K = kernel_size
    pad = K // 2
    channels = [C0] + [int(lay["scale"].shape[1]) for lay in conv_params]
    cmax_in = max(channels[:-1])
    cout_last = channels[-1]

    in_specs = [pl.BlockSpec((1, T, C0), lambda b: (b, 0, 0))]
    operands = [x]
    for l, lay in enumerate(conv_params):
        cin, cout = channels[l], channels[l + 1]
        in_specs.append(pl.BlockSpec((K * cin, cout), lambda b: (0, 0)))
        in_specs.append(pl.BlockSpec((1, cout), lambda b: (0, 0)))
        in_specs.append(pl.BlockSpec((1, cout), lambda b: (0, 0)))
        operands += [lay["w2d"], lay["scale"], lay["bias"]]

    return pl.pallas_call(
        _make_conv_stack_kernel(channels, K, T),
        out_shape=jax.ShapeDtypeStruct((B, T, cout_last), jnp.float32),
        grid=(B,),
        in_specs=in_specs,
        out_specs=pl.BlockSpec((1, T, cout_last), lambda b: (b, 0, 0)),
        scratch_shapes=[
            pltpu.VMEM((T + 2 * pad, cmax_in), jnp.float32),      # zero-padded activation
            pltpu.VMEM((T, K * cmax_in), jnp.float32),            # im2col buffer
        ],
        compiler_params=pltpu.CompilerParams(
            dimension_semantics=("parallel",),                    # batch shards across TCs on v7x
            vmem_limit_bytes=VMEM_LIMIT),
    )(*operands)


# ---------------------- batched bidirectional GRU layer ----------------------
def _make_bigru_kernel(T, Bp, H):
    def kernel(ns_ref, len_ref, x_ref,
               wih_f_ref, whh_f_ref, bih_f_ref, bhh_f_ref,
               wih_b_ref, whh_b_ref, bih_b_ref, bhh_b_ref,
               o_ref, xpf_ref, xpb_ref):
        # x_ref: (T*Bp, Cin) time-major;  o_ref: (T*Bp, 2H);  xp*: (T*Bp, 3H) scratch.
        x16 = x_ref[...].astype(jnp.bfloat16)
        # Bulk input projections for both directions (the FLOP-heavy matmuls, done once).
        xpf_ref[...] = jnp.dot(x16, wih_f_ref[...],
                               preferred_element_type=jnp.float32) + bih_f_ref[...]
        xpb_ref[...] = jnp.dot(x16, wih_b_ref[...],
                               preferred_element_type=jnp.float32) + bih_b_ref[...]
        # pad_packed_sequence pads with zeros for t >= length.
        o_ref[...] = jnp.zeros(o_ref.shape, o_ref.dtype)

        whh_f = whh_f_ref[...]
        bhh_f = bhh_f_ref[...]
        whh_b = whh_b_ref[...]
        bhh_b = bhh_b_ref[...]
        lens = len_ref[...]                                       # (Bp, 1) int32
        ns = ns_ref[0]                                            # max(lengths)

        def gru_cell(xp_t, h, whh, bhh):
            hp = jnp.dot(h.astype(jnp.bfloat16), whh,
                         preferred_element_type=jnp.float32) + bhh
            r = jax.nn.sigmoid(xp_t[:, 0:H] + hp[:, 0:H])
            z = jax.nn.sigmoid(xp_t[:, H:2 * H] + hp[:, H:2 * H])
            n = jnp.tanh(xp_t[:, 2 * H:3 * H] + r * hp[:, 2 * H:3 * H])
            return (1.0 - z) * n + z * h

        def step(s, carry):
            h_f, h_b = carry
            # ---- forward direction, t = s ----
            rf = pl.multiple_of(s * Bp, Bp)
            hf_new = gru_cell(xpf_ref[pl.ds(rf, Bp), :], h_f, whh_f, bhh_f)
            vf = s < lens                                         # (Bp, 1) packing mask
            o_ref[pl.ds(rf, Bp), 0:H] = jnp.where(vf, hf_new, 0.0)
            h_f = jnp.where(vf, hf_new, h_f)
            # ---- backward direction, t = ns - 1 - s (interleaved in the same loop) ----
            tb = ns - 1 - s
            rb = pl.multiple_of(tb * Bp, Bp)
            hb_new = gru_cell(xpb_ref[pl.ds(rb, Bp), :], h_b, whh_b, bhh_b)
            vb = tb < lens
            h_b = jnp.where(vb, hb_new, 0.0)   # state stays at h0=0 until t < length
            o_ref[pl.ds(rb, Bp), H:2 * H] = h_b
            return h_f, h_b

        h0 = jnp.zeros((Bp, H), jnp.float32)
        lax.fori_loop(0, ns, step, (h0, h0))   # dynamic trip count: skip padded timesteps

    return kernel


def bigru(x2d, lengths_col, n_steps, p, T, Bp):
    H = p["whh_f"].shape[0]
    vmem = pl.BlockSpec(memory_space=pltpu.MemorySpace.VMEM)
    return pl.pallas_call(
        _make_bigru_kernel(T, Bp, H),
        out_shape=jax.ShapeDtypeStruct((T * Bp, 2 * H), jnp.float32),
        in_specs=[pl.BlockSpec(memory_space=pltpu.MemorySpace.SMEM)]   # n_steps scalar
                 + [vmem] * 10,                                        # lens, x, 8 weights
        out_specs=vmem,
        scratch_shapes=[pltpu.VMEM((T * Bp, 3 * H), jnp.float32),
                        pltpu.VMEM((T * Bp, 3 * H), jnp.float32)],
        compiler_params=pltpu.CompilerParams(vmem_limit_bytes=VMEM_LIMIT),
    )(n_steps, lengths_col, x2d,
      p["wih_f"], p["whh_f"], p["bih_f"], p["bhh_f"],
      p["wih_b"], p["whh_b"], p["bih_b"], p["bhh_b"])


# ------------------------------ parameter setup --------------------------------
def init_params(key, in_channels, kernel_size, filter_sizes, hidden):
    params = {"kernel_size": kernel_size, "convs": []}
    filters = [in_channels] + list(filter_sizes)
    eps = 1e-5
    for i in range(len(filter_sizes)):
        key, k_w, k_g, k_b, k_m, k_v = jax.random.split(key, 6)
        cin, cout = filters[i], filters[i + 1]
        bound = 1.0 / (cin * kernel_size) ** 0.5
        w = jax.random.uniform(k_w, (kernel_size, cin, cout), jnp.float32, -bound, bound)
        gamma = jax.random.uniform(k_g, (1, cout), jnp.float32, 0.5, 1.5)
        beta = jax.random.normal(k_b, (1, cout), jnp.float32) * 0.1
        rmean = jax.random.normal(k_m, (1, cout), jnp.float32) * 0.1
        rvar = jax.random.uniform(k_v, (1, cout), jnp.float32, 0.5, 1.5)
        scale = gamma / jnp.sqrt(rvar + eps)
        bias = beta - rmean * scale
        params["convs"].append({
            # im2col weight layout: row (k*cin + c) <-> tap k, input channel c (bf16 operand)
            "w2d": w.reshape(kernel_size * cin, cout).astype(jnp.bfloat16),
            "scale": scale, "bias": bias,
        })

    def gru_dir(k, cin, h):
        k1, k2, k3, k4 = jax.random.split(k, 4)
        bound = 1.0 / h ** 0.5
        return {
            "wih": jax.random.uniform(k1, (cin, 3 * h), jnp.float32, -bound, bound).astype(jnp.bfloat16),
            "whh": jax.random.uniform(k2, (h, 3 * h), jnp.float32, -bound, bound).astype(jnp.bfloat16),
            "bih": jax.random.uniform(k3, (1, 3 * h), jnp.float32, -bound, bound),
            "bhh": jax.random.uniform(k4, (1, 3 * h), jnp.float32, -bound, bound),
        }

    def merge(f, b):
        return {"wih_f": f["wih"], "whh_f": f["whh"], "bih_f": f["bih"], "bhh_f": f["bhh"],
                "wih_b": b["wih"], "whh_b": b["whh"], "bih_b": b["bih"], "bhh_b": b["bhh"]}

    key, kf1, kb1, kf2, kb2 = jax.random.split(key, 5)
    params["gru1"] = merge(gru_dir(kf1, filter_sizes[-1], hidden),
                           gru_dir(kb1, filter_sizes[-1], hidden))
    params["gru2"] = merge(gru_dir(kf2, 2 * hidden, hidden),
                           gru_dir(kb2, 2 * hidden, hidden))
    return params


# ------------------------------- forward pass ----------------------------------
def content_encoder_forward(params, inputs, input_lengths, t_out):
    B, T, _ = inputs.shape
    H = params["gru1"]["whh_f"].shape[0]

    # --- fused conv + BN stack ---
    y = conv_stack(inputs, params["convs"], params["kernel_size"])    # (B, T, C)

    # --- to time-major 2D layout, batch padded to a full sublane tile (Bp rows) ---
    Bp = ((B + SUBLANES - 1) // SUBLANES) * SUBLANES
    y = jnp.transpose(y, (1, 0, 2))                                   # (T, B, C)
    y = jnp.pad(y, ((0, 0), (0, Bp - B), (0, 0)))                     # (T, Bp, C)
    x2d = y.reshape(T * Bp, y.shape[-1])                              # row = t*Bp + b

    lens = input_lengths.astype(jnp.int32)
    lens_col = jnp.pad(lens, (0, Bp - B)).reshape(Bp, 1)              # padded rows: length 0
    n_steps = jnp.reshape(jnp.minimum(jnp.max(lens), T).astype(jnp.int32), (1,))

    # Two bi-GRU layers chained directly in the lane-dense time-major 2D layout.
    h1 = bigru(x2d, lens_col, n_steps, params["gru1"], T, Bp)         # (T*Bp, 2H)
    h2 = bigru(h1, lens_col, n_steps, params["gru2"], T, Bp)          # (T*Bp, 2H)

    out = h2.reshape(T, Bp, 2 * H).transpose(1, 0, 2)                 # (Bp, T, 2H)
    # pad_packed_sequence(batch_first=True) truncates time to max(input_lengths).
    return out[:B, :t_out]


if __name__ == "__main__":
    B, T = 2, 16
    in_channels, kernel_size, filter_sizes, hidden = 16, 5, [32, 32, 32], 32

    key = jax.random.PRNGKey(0)
    k_in, k_par = jax.random.split(key)
    inputs = jax.random.uniform(k_in, (B, T, in_channels), jnp.float32)   # (B, T, C)
    input_lengths = jnp.array([12, 9], dtype=jnp.int32)
    t_out = 12                                            # = max(input_lengths)

    params = init_params(k_par, in_channels, kernel_size, filter_sizes, hidden)
    out = content_encoder_forward(params, inputs, input_lengths, t_out)
    out = jax.block_until_ready(out)

    assert out.shape == (B, t_out, 2 * hidden), out.shape
    assert bool(jnp.all(jnp.isfinite(out)))
    print("KERNEL_OK")
</pallas_src>

<mosaic_0001>
module attributes {stable_mosaic.version = 11 : i64} {
  func.func @kernel(%arg0: i32, %arg1: memref<1x16x16xf32, #tpu.memory_space<vmem>>, %arg2: memref<80x32xbf16, #tpu.memory_space<vmem>>, %arg3: memref<1x32xf32, #tpu.memory_space<vmem>>, %arg4: memref<1x32xf32, #tpu.memory_space<vmem>>, %arg5: memref<160x32xbf16, #tpu.memory_space<vmem>>, %arg6: memref<1x32xf32, #tpu.memory_space<vmem>>, %arg7: memref<1x32xf32, #tpu.memory_space<vmem>>, %arg8: memref<160x32xbf16, #tpu.memory_space<vmem>>, %arg9: memref<1x32xf32, #tpu.memory_space<vmem>>, %arg10: memref<1x32xf32, #tpu.memory_space<vmem>>, %arg11: memref<1x16x32xf32, #tpu.memory_space<vmem>>, %arg12: memref<20x32xf32, #tpu.memory_space<vmem>>, %arg13: memref<16x160xf32, #tpu.memory_space<vmem>>) attributes {dimension_semantics = [#tpu.dimension_semantics<parallel>], iteration_bounds = array<i64: 2>, scalar_prefetch = 0 : i64, scratch_operands = 2 : i64, tpu.core_type = #tpu.core_type<tc>, window_params = [{transform_indices = @transform_0, window_bounds = array<i64: 1, 16, 16>}, {pipeline_mode = #tpu.pipeline_mode<synchronous>, transform_indices = @transform_1, window_bounds = array<i64: 80, 32>}, {pipeline_mode = #tpu.pipeline_mode<synchronous>, transform_indices = @transform_2, window_bounds = array<i64: 1, 32>}, {pipeline_mode = #tpu.pipeline_mode<synchronous>, transform_indices = @transform_3, window_bounds = array<i64: 1, 32>}, {pipeline_mode = #tpu.pipeline_mode<synchronous>, transform_indices = @transform_4, window_bounds = array<i64: 160, 32>}, {pipeline_mode = #tpu.pipeline_mode<synchronous>, transform_indices = @transform_5, window_bounds = array<i64: 1, 32>}, {pipeline_mode = #tpu.pipeline_mode<synchronous>, transform_indices = @transform_6, window_bounds = array<i64: 1, 32>}, {pipeline_mode = #tpu.pipeline_mode<synchronous>, transform_indices = @transform_7, window_bounds = array<i64: 160, 32>}, {pipeline_mode = #tpu.pipeline_mode<synchronous>, transform_indices = @transform_8, window_bounds = array<i64: 1, 32>}, {pipeline_mode = #tpu.pipeline_mode<synchronous>, transform_indices = @transform_9, window_bounds = array<i64: 1, 32>}, {transform_indices = @transform_10, window_bounds = array<i64: 1, 16, 32>}]} {
    %cst = arith.constant 0.000000e+00 : f32
    %0 = vector.broadcast %cst : f32 to vector<20x32xf32>
    %c0 = arith.constant 0 : index
    %c0_0 = arith.constant 0 : index
    %1 = vector.load %arg12[%c0, %c0_0] : memref<20x32xf32, #tpu.memory_space<vmem>>, vector<20x32xf32>
    tpu.vector_store %arg12[%c0, %c0_0], %0 {strides = array<i32>} : memref<20x32xf32, #tpu.memory_space<vmem>>, vector<20x32xf32>,
    %c0_1 = arith.constant 0 : index
    %c0_2 = arith.constant 0 : index
    %c0_3 = arith.constant 0 : index
    %2 = vector.load %arg1[%c0_1, %c0_2, %c0_3] : memref<1x16x16xf32, #tpu.memory_space<vmem>>, vector<1x16x16xf32>
    %3 = vector.shape_cast %2 : vector<1x16x16xf32> to vector<16x16xf32>
    %c2 = arith.constant 2 : index
    %c0_4 = arith.constant 0 : index
    %4 = vector.load %arg12[%c2, %c0_4] : memref<20x32xf32, #tpu.memory_space<vmem>>, vector<16x16xf32>
    tpu.vector_store %arg12[%c2, %c0_4], %3 {strides = array<i32>} : memref<20x32xf32, #tpu.memory_space<vmem>>, vector<16x16xf32>,
    %c0_5 = arith.constant 0 : index
    %c0_6 = arith.constant 0 : index
    %5 = vector.load %arg12[%c0_5, %c0_6] : memref<20x32xf32, #tpu.memory_space<vmem>>, vector<16x16xf32>
    %c0_7 = arith.constant 0 : index
    %c0_8 = arith.constant 0 : index
    %6 = vector.load %arg13[%c0_7, %c0_8] : memref<16x160xf32, #tpu.memory_space<vmem>>, vector<16x16xf32>
    tpu.vector_store %arg13[%c0_7, %c0_8], %5 {strides = array<i32>} : memref<16x160xf32, #tpu.memory_space<vmem>>, vector<16x16xf32>,
    %c1 = arith.constant 1 : index
    %c0_9 = arith.constant 0 : index
    %7 = vector.load %arg12[%c1, %c0_9] : memref<20x32xf32, #tpu.memory_space<vmem>>, vector<16x16xf32>
    %c0_10 = arith.constant 0 : index
    %c16 = arith.constant 16 : index
    %8 = vector.load %arg13[%c0_10, %c16] : memref<16x160xf32, #tpu.memory_space<vmem>>, vector<16x16xf32>
    tpu.vector_store %arg13[%c0_10, %c16], %7 {strides = array<i32>} : memref<16x160xf32, #tpu.memory_space<vmem>>, vector<16x16xf32>,
    %c2_11 = arith.constant 2 : index
    %c0_12 = arith.constant 0 : index
    %9 = vector.load %arg12[%c2_11, %c0_12] : memref<20x32xf32, #tpu.memory_space<vmem>>, vector<16x16xf32>
    %c0_13 = arith.constant 0 : index
    %c32 = arith.constant 32 : index
    %10 = vector.load %arg13[%c0_13, %c32] : memref<16x160xf32, #tpu.memory_space<vmem>>, vector<16x16xf32>
    tpu.vector_store %arg13[%c0_13, %c32], %9 {strides = array<i32>} : memref<16x160xf32, #tpu.memory_space<vmem>>, vector<16x16xf32>,
    %c3 = arith.constant 3 : index
    %c0_14 = arith.constant 0 : index
    %11 = vector.load %arg12[%c3, %c0_14] : memref<20x32xf32, #tpu.memory_space<vmem>>, vector<16x16xf32>
    %c0_15 = arith.constant 0 : index
    %c48 = arith.constant 48 : index
    %12 = vector.load %arg13[%c0_15, %c48] : memref<16x160xf32, #tpu.memory_space<vmem>>, vector<16x16xf32>
    tpu.vector_store %arg13[%c0_15, %c48], %11 {strides = array<i32>} : memref<16x160xf32, #tpu.memory_space<vmem>>, vector<16x16xf32>,
    %c4 = arith.constant 4 : index
    %c0_16 = arith.constant 0 : index
    %13 = vector.load %arg12[%c4, %c0_16] : memref<20x32xf32, #tpu.memory_space<vmem>>, vector<16x16xf32>
    %c0_17 = arith.constant 0 : index
    %c64 = arith.constant 64 : index
    %14 = vector.load %arg13[%c0_17, %c64] : memref<16x160xf32, #tpu.memory_space<vmem>>, vector<16x16xf32>
    tpu.vector_store %arg13[%c0_17, %c64], %13 {strides = array<i32>} : memref<16x160xf32, #tpu.memory_space<vmem>>, vector<16x16xf32>,
    %c0_18 = arith.constant 0 : index
    %c0_19 = arith.constant 0 : index
    %15 = vector.load %arg13[%c0_18, %c0_19] : memref<16x160xf32, #tpu.memory_space<vmem>>, vector<16x80xf32>
    %16 = arith.truncf %15 : vector<16x80xf32> to vector<16x80xbf16>
    %c0_20 = arith.constant 0 : index
    %c0_21 = arith.constant 0 : index
    %17 = vector.load %arg2[%c0_20, %c0_21] : memref<80x32xbf16, #tpu.memory_space<vmem>>, vector<80x32xbf16>
    %cst_22 = arith.constant dense<0.000000e+00> : vector<16x32xf32>
    %18 = tpu.matmul %16, %17, %cst_22 {dimension_numbers = #tpu.dot_dimension_numbers<[1], [0], [0], [1], [0, 0, 1, 1], [], []>} : vector<16x80xbf16>, vector<80x32xbf16>, vector<16x32xf32> -> vector<16x32xf32>
    %c0_23 = arith.constant 0 : index
    %c0_24 = arith.constant 0 : index
    %19 = vector.load %arg3[%c0_23, %c0_24] : memref<1x32xf32, #tpu.memory_space<vmem>>, vector<1x32xf32>
    %20 = vector.broadcast %19 : vector<1x32xf32> to vector<16x32xf32>
    %21 = arith.mulf %18, %20 : vector<16x32xf32>
    %c0_25 = arith.constant 0 : index
    %c0_26 = arith.constant 0 : index
    %22 = vector.load %arg4[%c0_25, %c0_26] : memref<1x32xf32, #tpu.memory_space<vmem>>, vector<1x32xf32>
    %23 = vector.broadcast %22 : vector<1x32xf32> to vector<16x32xf32>
    %24 = arith.addf %21, %23 : vector<16x32xf32>
    %c2_27 = arith.constant 2 : index
    %c0_28 = arith.constant 0 : index
    %25 = vector.load %arg12[%c2_27, %c0_28] : memref<20x32xf32, #tpu.memory_space<vmem>>, vector<16x32xf32>
    tpu.vector_store %arg12[%c2_27, %c0_28], %24 {strides = array<i32>} : memref<20x32xf32, #tpu.memory_space<vmem>>, vector<16x32xf32>,
    %c0_29 = arith.constant 0 : index
    %c0_30 = arith.constant 0 : index
    %26 = vector.load %arg12[%c0_29, %c0_30] : memref<20x32xf32, #tpu.memory_space<vmem>>, vector<16x32xf32>
    %c0_31 = arith.constant 0 : index
    %c0_32 = arith.constant 0 : index
    %27 = vector.load %arg13[%c0_31, %c0_32] : memref<16x160xf32, #tpu.memory_space<vmem>>, vector<16x32xf32>
    tpu.vector_store %arg13[%c0_31, %c0_32], %26 {strides = array<i32>} : memref<16x160xf32, #tpu.memory_space<vmem>>, vector<16x32xf32>,
    %c1_33 = arith.constant 1 : index
    %c0_34 = arith.constant 0 : index
    %28 = vector.load %arg12[%c1_33, %c0_34] : memref<20x32xf32, #tpu.memory_space<vmem>>, vector<16x32xf32>
    %c0_35 = arith.constant 0 : index
    %c32_36 = arith.constant 32 : index
    %29 = vector.load %arg13[%c0_35, %c32_36] : memref<16x160xf32, #tpu.memory_space<vmem>>, vector<16x32xf32>
    tpu.vector_store %arg13[%c0_35, %c32_36], %28 {strides = array<i32>} : memref<16x160xf32, #tpu.memory_space<vmem>>, vector<16x32xf32>,
    %c2_37 = arith.constant 2 : index
    %c0_38 = arith.constant 0 : index
    %30 = vector.load %arg12[%c2_37, %c0_38] : memref<20x32xf32, #tpu.memory_space<vmem>>, vector<16x32xf32>
    %c0_39 = arith.constant 0 : index
    %c64_40 = arith.constant 64 : index
    %31 = vector.load %arg13[%c0_39, %c64_40] : memref<16x160xf32, #tpu.memory_space<vmem>>, vector<16x32xf32>
    tpu.vector_store %arg13[%c0_39, %c64_40], %30 {strides = array<i32>} : memref<16x160xf32, #tpu.memory_space<vmem>>, vector<16x32xf32>,
    %c3_41 = arith.constant 3 : index
    %c0_42 = arith.constant 0 : index
    %32 = vector.load %arg12[%c3_41, %c0_42] : memref<20x32xf32, #tpu.memory_space<vmem>>, vector<16x32xf32>
    %c0_43 = arith.constant 0 : index
    %c96 = arith.constant 96 : index
    %33 = vector.load %arg13[%c0_43, %c96] : memref<16x160xf32, #tpu.memory_space<vmem>>, vector<16x32xf32>
    tpu.vector_store %arg13[%c0_43, %c96], %32 {strides = array<i32>} : memref<16x160xf32, #tpu.memory_space<vmem>>, vector<16x32xf32>,
    %c4_44 = arith.constant 4 : index
    %c0_45 = arith.constant 0 : index
    %34 = vector.load %arg12[%c4_44, %c0_45] : memref<20x32xf32, #tpu.memory_space<vmem>>, vector<16x32xf32>
    %c0_46 = arith.constant 0 : index
    %c128 = arith.constant 128 : index
    %35 = vector.load %arg13[%c0_46, %c128] : memref<16x160xf32, #tpu.memory_space<vmem>>, vector<16x32xf32>
    tpu.vector_store %arg13[%c0_46, %c128], %34 {strides = array<i32>} : memref<16x160xf32, #tpu.memory_space<vmem>>, vector<16x32xf32>,
    %c0_47 = arith.constant 0 : index
    %c0_48 = arith.constant 0 : index
    %36 = vector.load %arg13[%c0_47, %c0_48] : memref<16x160xf32, #tpu.memory_space<vmem>>, vector<16x160xf32>
    %37 = arith.truncf %36 : vector<16x160xf32> to vector<16x160xbf16>
    %c0_49 = arith.constant 0 : index
    %c0_50 = arith.constant 0 : index
    %38 = vector.load %arg5[%c0_49, %c0_50] : memref<160x32xbf16, #tpu.memory_space<vmem>>, vector<160x32xbf16>
    %cst_51 = arith.constant dense<0.000000e+00> : vector<16x32xf32>
    %39 = tpu.matmul %37, %38, %cst_51 {dimension_numbers = #tpu.dot_dimension_numbers<[1], [0], [0], [1], [0, 0, 1, 1], [], []>} : vector<16x160xbf16>, vector<160x32xbf16>, vector<16x32xf32> -> vector<16x32xf32>
    %c0_52 = arith.constant 0 : index
    %c0_53 = arith.constant 0 : index
    %40 = vector.load %arg6[%c0_52, %c0_53] : memref<1x32xf32, #tpu.memory_space<vmem>>, vector<1x32xf32>
    %41 = vector.broadcast %40 : vector<1x32xf32> to vector<16x32xf32>
    %42 = arith.mulf %39, %41 : vector<16x32xf32>
    %c0_54 = arith.constant 0 : index
    %c0_55 = arith.constant 0 : index
    %43 = vector.load %arg7[%c0_54, %c0_55] : memref<1x32xf32, #tpu.memory_space<vmem>>, vector<1x32xf32>
    %44 = vector.broadcast %43 : vector<1x32xf32> to vector<16x32xf32>
    %45 = arith.addf %42, %44 : vector<16x32xf32>
    %c2_56 = arith.constant 2 : index
    %c0_57 = arith.constant 0 : index
    %46 = vector.load %arg12[%c2_56, %c0_57] : memref<20x32xf32, #tpu.memory_space<vmem>>, vector<16x32xf32>
    tpu.vector_store %arg12[%c2_56, %c0_57], %45 {strides = array<i32>} : memref<20x32xf32, #tpu.memory_space<vmem>>, vector<16x32xf32>,
    %c0_58 = arith.constant 0 : index
    %c0_59 = arith.constant 0 : index
    %47 = vector.load %arg12[%c0_58, %c0_59] : memref<20x32xf32, #tpu.memory_space<vmem>>, vector<16x32xf32>
    %c0_60 = arith.constant 0 : index
    %c0_61 = arith.constant 0 : index
    %48 = vector.load %arg13[%c0_60, %c0_61] : memref<16x160xf32, #tpu.memory_space<vmem>>, vector<16x32xf32>
    tpu.vector_store %arg13[%c0_60, %c0_61], %47 {strides = array<i32>} : memref<16x160xf32, #tpu.memory_space<vmem>>, vector<16x32xf32>,
    %c1_62 = arith.constant 1 : index
    %c0_63 = arith.constant 0 : index
    %49 = vector.load %arg12[%c1_62, %c0_63] : memref<20x32xf32, #tpu.memory_space<vmem>>, vector<16x32xf32>
    %c0_64 = arith.constant 0 : index
    %c32_65 = arith.constant 32 : index
    %50 = vector.load %arg13[%c0_64, %c32_65] : memref<16x160xf32, #tpu.memory_space<vmem>>, vector<16x32xf32>
    tpu.vector_store %arg13[%c0_64, %c32_65], %49 {strides = array<i32>} : memref<16x160xf32, #tpu.memory_space<vmem>>, vector<16x32xf32>,
    %c2_66 = arith.constant 2 : index
    %c0_67 = arith.constant 0 : index
    %51 = vector.load %arg12[%c2_66, %c0_67] : memref<20x32xf32, #tpu.memory_space<vmem>>, vector<16x32xf32>
    %c0_68 = arith.constant 0 : index
    %c64_69 = arith.constant 64 : index
    %52 = vector.load %arg13[%c0_68, %c64_69] : memref<16x160xf32, #tpu.memory_space<vmem>>, vector<16x32xf32>
    tpu.vector_store %arg13[%c0_68, %c64_69], %51 {strides = array<i32>} : memref<16x160xf32, #tpu.memory_space<vmem>>, vector<16x32xf32>,
    %c3_70 = arith.constant 3 : index
    %c0_71 = arith.constant 0 : index
    %53 = vector.load %arg12[%c3_70, %c0_71] : memref<20x32xf32, #tpu.memory_space<vmem>>, vector<16x32xf32>
    %c0_72 = arith.constant 0 : index
    %c96_73 = arith.constant 96 : index
    %54 = vector.load %arg13[%c0_72, %c96_73] : memref<16x160xf32, #tpu.memory_space<vmem>>, vector<16x32xf32>
    tpu.vector_store %arg13[%c0_72, %c96_73], %53 {strides = array<i32>} : memref<16x160xf32, #tpu.memory_space<vmem>>, vector<16x32xf32>,
    %c4_74 = arith.constant 4 : index
    %c0_75 = arith.constant 0 : index
    %55 = vector.load %arg12[%c4_74, %c0_75] : memref<20x32xf32, #tpu.memory_space<vmem>>, vector<16x32xf32>
    %c0_76 = arith.constant 0 : index
    %c128_77 = arith.constant 128 : index
    %56 = vector.load %arg13[%c0_76, %c128_77] : memref<16x160xf32, #tpu.memory_space<vmem>>, vector<16x32xf32>
    tpu.vector_store %arg13[%c0_76, %c128_77], %55 {strides = array<i32>} : memref<16x160xf32, #tpu.memory_space<vmem>>, vector<16x32xf32>,
    %c0_78 = arith.constant 0 : index
    %c0_79 = arith.constant 0 : index
    %57 = vector.load %arg13[%c0_78, %c0_79] : memref<16x160xf32, #tpu.memory_space<vmem>>, vector<16x160xf32>
    %58 = arith.truncf %57 : vector<16x160xf32> to vector<16x160xbf16>
    %c0_80 = arith.constant 0 : index
    %c0_81 = arith.constant 0 : index
    %59 = vector.load %arg8[%c0_80, %c0_81] : memref<160x32xbf16, #tpu.memory_space<vmem>>, vector<160x32xbf16>
    %cst_82 = arith.constant dense<0.000000e+00> : vector<16x32xf32>
    %60 = tpu.matmul %58, %59, %cst_82 {dimension_numbers = #tpu.dot_dimension_numbers<[1], [0], [0], [1], [0, 0, 1, 1], [], []>} : vector<16x160xbf16>, vector<160x32xbf16>, vector<16x32xf32> -> vector<16x32xf32>
    %c0_83 = arith.constant 0 : index
    %c0_84 = arith.constant 0 : index
    %61 = vector.load %arg9[%c0_83, %c0_84] : memref<1x32xf32, #tpu.memory_space<vmem>>, vector<1x32xf32>
    %62 = vector.broadcast %61 : vector<1x32xf32> to vector<16x32xf32>
    %63 = arith.mulf %60, %62 : vector<16x32xf32>
    %c0_85 = arith.constant 0 : index
    %c0_86 = arith.constant 0 : index
    %64 = vector.load %arg10[%c0_85, %c0_86] : memref<1x32xf32, #tpu.memory_space<vmem>>, vector<1x32xf32>
    %65 = vector.broadcast %64 : vector<1x32xf32> to vector<16x32xf32>
    %66 = arith.addf %63, %65 : vector<16x32xf32>
    %c0_87 = arith.constant 0 : index
    %c0_88 = arith.constant 0 : index
    %c0_89 = arith.constant 0 : index
    %67 = vector.load %arg11[%c0_87, %c0_88, %c0_89] : memref<1x16x32xf32, #tpu.memory_space<vmem>>, vector<1x16x32xf32>
    %68 = vector.shape_cast %67 : vector<1x16x32xf32> to vector<16x32xf32>
    %69 = vector.shape_cast %66 : vector<16x32xf32> to vector<1x16x32xf32>
    tpu.vector_store %arg11[%c0_87, %c0_88, %c0_89], %69 {strides = array<i32>} : memref<1x16x32xf32, #tpu.memory_space<vmem>>, vector<1x16x32xf32>,
    return
  }
  func.func @transform_0(%arg0: i32) -> (i32, i32, i32) {
    %c0_i32 = arith.constant 0 : i32
    %c0_i32_0 = arith.constant 0 : i32
    %c0_i32_1 = arith.constant 0 : i32
    return %arg0, %c0_i32, %c0_i32_0 : i32, i32, i32
  }
  func.func @transform_1(%arg0: i32) -> (i32, i32) {
    %c0_i32 = arith.constant 0 : i32
    %c0_i32_0 = arith.constant 0 : i32
    %c0_i32_1 = arith.constant 0 : i32
    return %c0_i32, %c0_i32_0 : i32, i32
  }
  func.func @transform_2(%arg0: i32) -> (i32, i32) {
    %c0_i32 = arith.constant 0 : i32
    %c0_i32_0 = arith.constant 0 : i32
    %c0_i32_1 = arith.constant 0 : i32
    return %c0_i32, %c0_i32_0 : i32, i32
  }
  func.func @transform_3(%arg0: i32) -> (i32, i32) {
    %c0_i32 = arith.constant 0 : i32
    %c0_i32_0 = arith.constant 0 : i32
    %c0_i32_1 = arith.constant 0 : i32
    return %c0_i32, %c0_i32_0 : i32, i32
  }
  func.func @transform_4(%arg0: i32) -> (i32, i32) {
    %c0_i32 = arith.constant 0 : i32
    %c0_i32_0 = arith.constant 0 : i32
    %c0_i32_1 = arith.constant 0 : i32
    return %c0_i32, %c0_i32_0 : i32, i32
  }
  func.func @transform_5(%arg0: i32) -> (i32, i32) {
    %c0_i32 = arith.constant 0 : i32
    %c0_i32_0 = arith.constant 0 : i32
    %c0_i32_1 = arith.constant 0 : i32
    return %c0_i32, %c0_i32_0 : i32, i32
  }
  func.func @transform_6(%arg0: i32) -> (i32, i32) {
    %c0_i32 = arith.constant 0 : i32
    %c0_i32_0 = arith.constant 0 : i32
    %c0_i32_1 = arith.constant 0 : i32
    return %c0_i32, %c0_i32_0 : i32, i32
  }
  func.func @transform_7(%arg0: i32) -> (i32, i32) {
    %c0_i32 = arith.constant 0 : i32
    %c0_i32_0 = arith.constant 0 : i32
    %c0_i32_1 = arith.constant 0 : i32
    return %c0_i32, %c0_i32_0 : i32, i32
  }
  func.func @transform_8(%arg0: i32) -> (i32, i32) {
    %c0_i32 = arith.constant 0 : i32
    %c0_i32_0 = arith.constant 0 : i32
    %c0_i32_1 = arith.constant 0 : i32
    return %c0_i32, %c0_i32_0 : i32, i32
  }
  func.func @transform_9(%arg0: i32) -> (i32, i32) {
    %c0_i32 = arith.constant 0 : i32
    %c0_i32_0 = arith.constant 0 : i32
    %c0_i32_1 = arith.constant 0 : i32
    return %c0_i32, %c0_i32_0 : i32, i32
  }
  func.func @transform_10(%arg0: i32) -> (i32, i32, i32) {
    %c0_i32 = arith.constant 0 : i32
    %c0_i32_0 = arith.constant 0 : i32
    %c0_i32_1 = arith.constant 0 : i32
    return %arg0, %c0_i32, %c0_i32_0 : i32, i32, i32
  }
}

</mosaic_0001>

<bundles_post_ra>
// kernel: tpu_custom_call.1
= control target key start
LH: loop header
LB: loop body
LE: loop exit
PB: predicated region body
PF: predicated region fallthrough
CT: control target
= control target key end

     0   :  { %15 = vsyncpa [#allocation5], 0  ;;  %s1535_s0 = inlined_call_operand.vmem [shape: f32[2,16,16], index: 0, kind: input, shape index: {}]   ;;  %s1536_s1 = inlined_call_operand.vmem [shape: bf16[80,32], index: 1, kind: input, shape index: {}]   ;;  %s1537_s2 = inlined_call_operand.vmem [shape: f32[1,32], index: 2, kind: input, shape index: {}]   ;;  %s1538_s3 = inlined_call_operand.vmem [shape: f32[1,32], index: 3, kind: input, shape index: {}]   ;;  %s1539_s4 = inlined_call_operand.vmem [shape: bf16[160,32], index: 4, kind: input, shape index: {}]   ;;  %s1540_s5 = inlined_call_operand.vmem [shape: f32[1,32], index: 5, kind: input, shape index: {}]   ;;  %s1541_s6 = inlined_call_operand.vmem [shape: f32[1,32], index: 6, kind: input, shape index: {}]   ;;  %s1542_s7 = inlined_call_operand.vmem [shape: bf16[160,32], index: 7, kind: input, shape index: {}]   ;;  %s1543_s8 = inlined_call_operand.vmem [shape: f32[1,32], index: 8, kind: input, shape index: {}]   ;;  %s1544_s9 = inlined_call_operand.vmem [shape: f32[1,32], index: 9, kind: input, shape index: {}]   ;;  %s1545_s10 = inlined_call_operand.hbm [shape: f32[2,16,32], index: 10, kind: output, shape index: {}]  }
   0x1   :  { %17 = vsyncpa [#allocation5 + $0x1], 0  ;;  %s1270_s13 = smov 0   ;;  %s1272_s14 = smov 0  }
   0x2   :  { %s1274_s15 = smov 0   ;;  %s1276_s16 = smov 0  }
   0x3 LB: > { %s1291_s17 = sadd.s32 4294967295, %s1202_s16   ;;  %s1000_s18 = sadd.s32 4294967294, %s1202_s16   ;;  %s1202_s16 = sphi %s1276_s16, %s1551_s16   ;;  %s1198_s15 = sphi %s1274_s15, %s1550_s15   ;;  %s1194_s14 = sphi %s1272_s14, %s1549_s14   ;;  %s1190_s13 = sphi %s1270_s13, %s1548_s13  }
   0x4   : > { %s1295_s19 = sadd.s32 1, %s1202_s16   ;;  %s245_s20 = sadd.s32 1, %s1198_s15 }
   0x5   : > { %s242_s21 = ssub.s32 %s1202_s16, %s1295_s19  ;;  %p255_p0 = scmp.ne.s32.totalorder %s1198_s15, %s1194_s14 }
   0x6   : > { %p243_p1 = scmp.eq.s32.totalorder %s242_s21, 0  ;;  %p256_p2 = scmp.eq.s32.totalorder %s1291_s17, 1 }
   0x7   : > { %p261_p3 = scmp.ne.s32.totalorder %s1194_s14, %s1190_s13  ;;  %p262_p4 = scmp.eq.s32.totalorder %s1000_s18, 1 }
   0x8   : > { %s1306_s22 = scalar_select %p243_p1, %s1198_s15, %s245_s20  }
   0x9   : > { %p1308_p5 = por %p256_p2, %p255_p0  ;;  %p1312_p6 = por %p262_p4, %p261_p3 }
   0xa   : > { %p1003_p7 = scmp.ge.s32.totalorder %s1202_s16, 1  ;;  %p315_p8 = scmp.lt.s32.totalorder %s1202_s16, 3 }
   0xc   : > { %p316_p9 = pnand %p1003_p7, %p315_p8 }
   0xd   : > { %p353_p10 = scmp.lt.s32.totalorder (!%p316_p9), %s1291_s17, 1  ;;  %s1206_s26 = smov (!%p316_p9), 16  }
   0xe   : > { %319 = sbr.rel (%p316_p9) target bundleno = 1069 (0x42d), region = 60  ;;  %s1209_s12 = smov (!%p316_p9), 64  }
   0xf   : > { %s1211_s29 = smov (!%p316_p9), 96  }
  0x13   : > { %vm359_vm0 = vcmask 261120   ;;  %vm362_vm1 = vcmask 257024   ;;  %v1204_v0 = vmov 0.0   ;;  %s354_s25 = scalar_select %p353_p10, %s1291_s17, 1  ;;  %v1117_v1 = vld [vmem:[%s1536_s1 + $0x20] sm:$0xff]   ;;  %vm366_vm2 = vcmask 130048  }
  0x14   : > { %360 = vst.msk [vmem:[#allocation2] sm:$0xff] %vm359_vm0, %v1204_v0  ;;  %361 = vst.msk [vmem:[#allocation2 + $0x8] sm:$0xff] %vm359_vm0, %v1204_v0  ;;  %1054 = vmatprep.subr.bf16.mxu0 %v1204_v0  ;;  %v1118_v4 = vld [vmem:[%s1536_s1 + $0x18] sm:$0xff]   ;;  %v1119_v5 = vld [vmem:[%s1536_s1 + $0x10] sm:$0xff]   ;;  %vm1207_vm3 = vmmov 0   ;;  %vm383_vm4 = vcmask 261248  }
  0x15   : > { %363 = vst.msk [vmem:[#allocation2 + $0x10] sm:$0xf] %vm362_vm1, %v1204_v0  ;;  %s1046_s28 = sshll.u32 %s354_s25, 4  ;;  %1055 = vmatpush3.bf16.msra.mxu0 %v1117_v1  ;;  %s1205_s25 = smov 32   ;;  %1064 = vmatprep.mubr.msk.bf16.mxu0 %vm1207_vm3, %v1204_v0  ;;  %v1120_v12 = vld [vmem:[%s1536_s1 + $0x8] sm:$0xff]   ;;  %v1121_v14 = vld [vmem:[%s1536_s1] sm:$0xff]  }
  0x16   : > { %s357_s11 = scalar_lea.vmem %s1535_s0, %s1046_s28  ;;  %1056 = vmatprep.subr.bf16.mxu0 %v1204_v0  ;;  %vm396_vm5 = vcmask 392448   ;;  %vm409_vm6 = vcmask 523648   ;;  %vm422_vm7 = vcmask 654848   ;;  %vm468_vm8 = vcmask 654336   ;;  %v1122_v29 = vld [vmem:[%s1539_s4 + $0x38] sm:$0xff]   ;;  %v1123_v31 = vld [vmem:[%s1539_s4 + $0x30] sm:$0xff]  }
  0x17   : > { %v364_v2 = vld [vmem:[%s357_s11] sm:$0xff]  ;;  %v365_v3 = vld [vmem:[%s357_s11 + $0x8] sm:$0xff]  ;;  %s1208_s11 = smov 48   ;;  %v1210_v30 = vmov 0   ;;  %v1126_v34 = vld [vmem:[%s1539_s4 + $0x18] sm:$0xff]   ;;  %vm547_vm9 = vcmask 523520  }
  0x18   : > { %367 = vst.msk [vmem:[#allocation2 + $0x2] sm:$0xff] %vm366_vm2, %v364_v2  ;;  %368 = vst.msk [vmem:[#allocation2 + $0xa] sm:$0xff] %vm366_vm2, %v365_v3  ;;  %669 = vmatprep.subr.bf16.mxu1 %v1210_v30  ;;  %v1124_v32 = vld [vmem:[%s1539_s4 + $0x28] sm:$0xff]   ;;  %v1125_v33 = vld [vmem:[%s1539_s4 + $0x20] sm:$0xff]   ;;  %vm560_vm10 = vcmask 785920   ;;  %vm573_vm11 = vcmask 1048320  }
  0x19   : > { %1057 = vmatpush3.bf16.msra.mxu0 %v1118_v4  ;;  %670 = vmatpush1.bf16.msra.mxu1 %v1122_v29  ;;  %v1013_v35 = vld [vmem:[%s1537_s2] ss:$0 sm:$0xff]  ;;  %v1127_v38 = vld [vmem:[%s1539_s4 + $0x10] sm:$0xff]   ;;  %v1128_v43 = vld [vmem:[%s1539_s4 + $0x8] sm:$0xff]  }
  0x1a   : > { %1058 = vmatprep.subr.bf16.mxu0 %v1204_v0  ;;  %671 = vmatprep.subr.bf16.mxu1 %v1210_v30  ;;  %v1014_v37 = vld [vmem:[%s1538_s3] ss:$0 sm:$0xff]  ;;  %v1130_v50 = vld [vmem:[%s1539_s4 + $0x48] sm:$0xff]  }
  0x1b   : > { %v1129_v47 = vld [vmem:[%s1539_s4] sm:$0xff]  }
  0x1c   : > { %v1131_v51 = vld [vmem:[%s1539_s4 + $0x40] sm:$0xff]  }
  0x1d   : > { %1059 = vmatpush3.bf16.msra.mxu0 %v1119_v5  ;;  %672 = vmatpush1.bf16.msra.mxu1 %v1123_v31  ;;  %v1141_v29 = vld [vmem:[%s1542_s7 + $0x40] sm:$0xff]  }
  0x1e   : > { %1060 = vmatprep.subr.bf16.mxu0 %v1204_v0  ;;  %673 = vmatprep.subr.bf16.mxu1 %v1210_v30 }
  0x1f   : > { %v386_v6 = vld [vmem:[#allocation2 + $0x2] sm:$0xff]  ;;  %v387_v8 = vld [vmem:[#allocation2 + $0xa] sm:$0xff] }
  0x20   : > { %v373_v7 = vld [vmem:[#allocation2 + $0x1] sm:$0xff]  ;;  %390 = vrot.lane.b32.xlu1 %v386_v6, %s1205_s25  ;;  %v374_v9 = vld [vmem:[#allocation2 + $0x9] sm:$0xff] }
  0x21   : > { %377 = vrot.lane.b32.xlu0 %v373_v7, %s1206_s26  ;;  %v369_v10 = vld [vmem:[#allocation2] sm:$0xff]  ;;  %v370_v11 = vld [vmem:[#allocation2 + $0x8] sm:$0xff]  ;;  %1061 = vmatpush3.bf16.msra.mxu0 %v1120_v12  ;;  %v1136_v12 = vld [vmem:[%s1542_s7 + $0x18] sm:$0xff]  }
  0x22   : > { %371 = vst.msk [vmem:[#allocation3] sm:$0xff] %vm366_vm2, %v369_v10  ;;  %v400_v13 = vld [vmem:[#allocation2 + $0xb] sm:$0xff]  ;;  %372 = vst.msk [vmem:[#allocation3 + $0x10] sm:$0xff] %vm366_vm2, %v370_v11  ;;  %v399_v15 = vld [vmem:[#allocation2 + $0x3] sm:$0xff]  ;;  %1062 = vmatprep.subr.bf16.mxu0 %v1204_v0  ;;  %674 = vmatpush1.bf16.msra.mxu1 %v1124_v32 }
  0x23   : > { %v413_v16 = vld [vmem:[#allocation2 + $0xc] sm:$0xff]  ;;  %v412_v17 = vld [vmem:[#allocation2 + $0x4] sm:$0xff]  ;;  %675 = vmatprep.subr.bf16.mxu1 %v1210_v30 }
  0x24   : > { %392 = vrot.lane.b32.xlu1 %v387_v8, %s1205_s25  ;;  %v1132_v8 = vld [vmem:[%s1542_s7 + $0x38] sm:$0xff]   ;;  %v1134_v10 = vld [vmem:[%s1542_s7 + $0x28] sm:$0xff]   ;;  %v1135_v11 = vld [vmem:[%s1542_s7 + $0x20] sm:$0xff]  }
  0x25   : > { %379 = vrot.lane.b32.xlu0 %v374_v9, %s1206_s26  ;;  %1063 = vmatpush3.bf16.msra.mxu0 %v1121_v14  ;;  %v1133_v9 = vld [vmem:[%s1542_s7 + $0x30] sm:$0xff]   ;;  %s1047_s26 = sshll.u32 %s1291_s17, 8 }
  0x26   : > { %863 = vmatprep.subr.bf16.mxu0 %v1210_v30  ;;  %676 = vmatpush1.bf16.msra.mxu1 %v1125_v33 }
  0x27   : > { %677 = vmatprep.subr.bf16.mxu1 %v1210_v30 }
  0x28   : > { %405 = vrot.lane.b32.xlu1 %v400_v13, %s1208_s11  ;;  %v1026_v13 = vld [vmem:[%s1540_s5] ss:$0 sm:$0xff] }
  0x29   : > { %403 = vrot.lane.b32.xlu0 %v399_v15, %s1208_s11  ;;  %v1027_v15 = vld [vmem:[%s1541_s6] ss:$0 sm:$0xff] }
  0x2a   : > { %678 = vmatpush1.bf16.msra.mxu1 %v1126_v34 }
  0x2b   : > { %679 = vmatprep.subr.bf16.mxu1 %v1210_v30 }
  0x2c   : > { %418 = vrot.lane.b32.xlu1 %v413_v16, %s1209_s12  ;;  %v1137_v16 = vld [vmem:[%s1542_s7 + $0x10] sm:$0xff]  }
  0x2d   : > { %416 = vrot.lane.b32.xlu0 %v412_v17, %s1209_s12 }
  0x2e   : > { %680 = vmatpush1.bf16.msra.mxu1 %v1127_v38 }
  0x2f   : > { %681 = vmatprep.subr.bf16.mxu1 %v1210_v30 }
  0x32   : > { %682 = vmatpush1.bf16.msra.mxu1 %v1128_v43 }
  0x33   : > { %683 = vmatprep.subr.bf16.mxu1 %v1210_v30 }
  0x36   : > { %684 = vmatpush1.bf16.msra.mxu1 %v1129_v47 }
  0x37   : > { %697 = vmatprep.subr.bf16.mxu1 %v1210_v30 }
  0x3a   : > { %698 = vmatpush2.bf16.msra.mxu1 %v1130_v50  ;;  %v1039_v50 = vld [vmem:[%s1543_s8] ss:$0 sm:$0xff] }
  0x3b   : > { %699 = vmatprep.subr.bf16.mxu1 %v1210_v30 }
  0x3e   : > { %700 = vmatpush2.bf16.msra.mxu1 %v1131_v51 }
  0x92   : > { %v391_v18 = vpop.permute.xlu1 %390 }
  0x93   : > { %v378_v19 = vpop.permute.xlu0 %377 }
  0x94   : > { %384 = vst.msk [vmem:[#allocation3] sm:$0xff] %vm383_vm4, %v378_v19 }
  0x95   : > { %397 = vst.msk [vmem:[#allocation3] sm:$0xff] %vm396_vm5, %v391_v18 }
  0x96   : > { %v393_v20 = vpop.permute.xlu1 %392 }
  0x97   : > { %v380_v21 = vpop.permute.xlu0 %379 }
  0x98   : > { %385 = vst.msk [vmem:[#allocation3 + $0x10] sm:$0xff] %vm383_vm4, %v380_v21  ;;  %v1138_v21 = vld [vmem:[%s1542_s7 + $0x8] sm:$0xff]  }
  0x99   : > { %398 = vst.msk [vmem:[#allocation3 + $0x10] sm:$0xff] %vm396_vm5, %v393_v20 }
  0x9a   : > { %v406_v22 = vpop.permute.xlu1 %405 }
  0x9b   : > { %v404_v23 = vpop.permute.xlu0 %403  ;;  %411 = vst.msk [vmem:[#allocation3 + $0x10] sm:$0xff] %vm409_vm6, %v406_v22 }
  0x9c   : > { %410 = vst.msk [vmem:[#allocation3] sm:$0xff] %vm409_vm6, %v404_v23 }
  0x9e   : > { %v419_v24 = vpop.permute.xlu1 %418 }
  0x9f   : > { %v417_v25 = vpop.permute.xlu0 %416  ;;  %424 = vst.msk [vmem:[#allocation3 + $0x10] sm:$0xff] %vm422_vm7, %v419_v24 }
  0xa0   : > { %423 = vst.msk [vmem:[#allocation3] sm:$0xff] %vm422_vm7, %v417_v25  ;;  %v1139_v25 = vld [vmem:[%s1542_s7] sm:$0xff]  }
  0xa6   : > { %v426_v27 = vld [vmem:[#allocation3 + $0x10] sm:$0xff] }
  0xa7   : > { %v425_v26 = vld [vmem:[#allocation3] sm:$0xff] }
  0xa8   : > { %v427_v28 = vpack.c.bf16 %v426_v27, %v425_v26 }
  0xaa   : > { %1065 = vmatmul.mubr.msk.bf16.vlgmr.msra.gmra.mxu0 %vm468_vm8, %v427_v28  ;;  %v1140_v28 = vld [vmem:[%s1542_s7 + $0x48] sm:$0xff]  }
  0xab   : > { %864 = vmatpush1.bf16.msra.mxu0 %v1132_v8 }
  0xac   : > { %865 = vmatprep.subr.bf16.mxu0 %v1210_v30 }
  0xaf   : > { %866 = vmatpush1.bf16.msra.mxu0 %v1133_v9 }
  0xb0   : > { %867 = vmatprep.subr.bf16.mxu0 %v1210_v30 }
  0xb3   : > { %868 = vmatpush1.bf16.msra.mxu0 %v1134_v10 }
  0xb4   : > { %869 = vmatprep.subr.bf16.mxu0 %v1210_v30 }
  0xb7   : > { %870 = vmatpush1.bf16.msra.mxu0 %v1135_v11 }
  0xb8   : > { %871 = vmatprep.subr.bf16.mxu0 %v1210_v30 }
  0xbb   : > { %872 = vmatpush1.bf16.msra.mxu0 %v1136_v12 }
  0xbc   : > { %873 = vmatprep.subr.bf16.mxu0 %v1210_v30 }
  0xbf   : > { %874 = vmatpush1.bf16.msra.mxu0 %v1137_v16 }
  0xc0   : > { %875 = vmatprep.subr.bf16.mxu0 %v1210_v30 }
  0xc3   : > { %876 = vmatpush1.bf16.msra.mxu0 %v1138_v21 }
  0xc4   : > { %877 = vmatprep.subr.bf16.mxu0 %v1210_v30 }
  0xc7   : > { %878 = vmatpush1.bf16.msra.mxu0 %v1139_v25 }
  0xc8   : > { %891 = vmatprep.subr.bf16.mxu0 %v1210_v30 }
  0xcb   : > { %892 = vmatpush2.bf16.msra.mxu0 %v1140_v28 }
  0xcc   : > { %893 = vmatprep.subr.bf16.mxu0 %v1210_v30 }
  0xcf   : > { %894 = vmatpush2.bf16.msra.mxu0 %v1141_v29 }
 0x16a   : > { %v506_v36 = vpop.f32.mrf.mxu0 }
 0x16b   : > { %v520_v39 = vmul.f32 %v1013_v35, %v506_v36 }
 0x16c   : > { %v1066_v40 = vpop.f32.mrf.mxu0 }
 0x16d   : > { %v529_v41 = vadd.f32 %v1014_v37, %v520_v39 }
 0x16e   : > { %v509_v42 = vpop.f32.mrf.mxu0 }
 0x16f   : > { %531 = vst.msk [vmem:[#allocation2 + $0x2] sm:$0xff] %vm359_vm0, %v529_v41  ;;  %v521_v44 = vmul.f32 %v1013_v35, %v509_v42 }
 0x170   : > { %v1067_v45 = vpop.f32.mrf.mxu0 }
 0x171   : > { %v530_v46 = vadd.f32 %v1014_v37, %v521_v44 }
 0x173   : > { %532 = vst.msk [vmem:[#allocation2 + $0xa] sm:$0xff] %vm359_vm0, %v530_v46 }
 0x176   : > { %v537_v48 = vld [vmem:[#allocation2 + $0x1] sm:$0xff] }
 0x177   : > { %v533_v49 = vld [vmem:[#allocation2] sm:$0xff]  ;;  %541 = vrot.lane.b32.xlu0 %v537_v48, %s1205_s25 }
 0x178   : > { %535 = vst.msk [vmem:[#allocation3] sm:$0xff] %vm359_vm0, %v533_v49  ;;  %v550_v52 = vld [vmem:[#allocation2 + $0x2] sm:$0xff] }
 0x17a   : > { %v538_v53 = vld [vmem:[#allocation2 + $0x9] sm:$0xff] }
 0x17b   : > { %554 = vrot.lane.b32.xlu0 %v550_v52, %s1209_s12  ;;  %543 = vrot.lane.b32.xlu1 %v538_v53, %s1205_s25  ;;  %v576_v54 = vld [vmem:[#allocation2 + $0x4] sm:$0xff]  ;;  %v577_v55 = vld [vmem:[#allocation2 + $0xc] sm:$0xff]  ;;  %v1040_v52 = vld [vmem:[%s1544_s9] ss:$0 sm:$0xff] }
 0x17c   : > { %578 = vst.msk [vmem:[#allocation3 + $0x8] sm:$0xff] %vm359_vm0, %v576_v54  ;;  %579 = vst.msk [vmem:[#allocation3 + $0x18] sm:$0xff] %vm359_vm0, %v577_v55  ;;  %v534_v56 = vld [vmem:[#allocation2 + $0x8] sm:$0xff] }
 0x17d   : > { %536 = vst.msk [vmem:[#allocation3 + $0x10] sm:$0xff] %vm359_vm0, %v534_v56  ;;  %v563_v57 = vld [vmem:[#allocation2 + $0x3] sm:$0xff]  ;;  %v564_v59 = vld [vmem:[#allocation2 + $0xb] sm:$0xff] }
 0x17e   : > { %v551_v58 = vld [vmem:[#allocation2 + $0xa] sm:$0xff] }
 0x17f   : > { %567 = vrot.lane.b32.xlu0 %v563_v57, %s1211_s29  ;;  %556 = vrot.lane.b32.xlu1 %v551_v58, %s1209_s12 }
 0x183   : > { %569 = vrot.lane.b32.xlu1 %v564_v59, %s1211_s29  ;;  %v581_v60 = vld [vmem:[#allocation3 + $0x8] sm:$0xff]  ;;  %v583_v61 = vld [vmem:[#allocation3 + $0x18] sm:$0xff] }
 0x184   : > { %v585_v62 = vpack.c.bf16 %v583_v61, %v581_v60 }
 0x186   : > { %1025 = vmatprep.mubr.msk.bf16.mxu1 %vm359_vm0, %v585_v62 }
 0x1e9   : > { %v542_v63 = vpop.permute.xlu0 %541 }
 0x1ea   : > { %548 = vst.msk [vmem:[#allocation3] sm:$0xff] %vm547_vm9, %v542_v63 }
 0x1ed   : > { %v555_v0 = vpop.permute.xlu0 %554  ;;  %v544_v1 = vpop.permute.xlu1 %543 }
 0x1ee   : > { %561 = vst.msk [vmem:[#allocation3] sm:$0xff] %vm560_vm10, %v555_v0 }
 0x1ef   : > { %549 = vst.msk [vmem:[#allocation3 + $0x10] sm:$0xff] %vm547_vm9, %v544_v1 }
 0x1f1   : > { %v568_v2 = vpop.permute.xlu0 %567  ;;  %v557_v3 = vpop.permute.xlu1 %556 }
 0x1f2   : > { %574 = vst.msk [vmem:[#allocation3] sm:$0xff] %vm573_vm11, %v568_v2 }
 0x1f3   : > { %562 = vst.msk [vmem:[#allocation3 + $0x10] sm:$0xff] %vm560_vm10, %v557_v3 }
 0x1f5   : > { %v570_v4 = vpop.permute.xlu1 %569 }
 0x1f6   : > { %575 = vst.msk [vmem:[#allocation3 + $0x10] sm:$0xff] %vm573_vm11, %v570_v4 }
 0x1f9   : > { %v580_v5 = vld [vmem:[#allocation3] sm:$0xff] }
 0x1fd   : > { %v582_v6 = vld [vmem:[#allocation3 + $0x10] sm:$0xff] }
 0x1fe   : > { %v584_v7 = vpack.c.bf16 %v582_v6, %v580_v5 }
 0x200   : > { %702 = vmatmul.mubr.bf16.vlgmr.msra.gmra.mxu1 %v584_v7 }
 0x2c0   : > { %v703_v14 = vpop.f32.mrf.mxu1 }
 0x2c1   : > { %v717_v17 = vmul.f32 %v1026_v13, %v703_v14 }
 0x2c2   : > { %v705_v18 = vpop.f32.mrf.mxu1 }
 0x2c3   : > { %v726_v19 = vadd.f32 %v1027_v15, %v717_v17 }
 0x2c4   : > { %v706_v20 = vpop.f32.mrf.mxu1 }
 0x2c5   : > { %728 = vst.msk [vmem:[#allocation2 + $0x2] sm:$0xff] %vm359_vm0, %v726_v19  ;;  %v718_v22 = vmul.f32 %v1026_v13, %v706_v20 }
 0x2c6   : > { %v708_v23 = vpop.f32.mrf.mxu1 }
 0x2c7   : > { %v727_v24 = vadd.f32 %v1027_v15, %v718_v22 }
 0x2c9   : > { %729 = vst.msk [vmem:[#allocation2 + $0xa] sm:$0xff] %vm359_vm0, %v727_v24 }
 0x2cc   : > { %v734_v26 = vld [vmem:[#allocation2 + $0x1] sm:$0xff] }
 0x2cd   : > { %v730_v27 = vld [vmem:[#allocation2] sm:$0xff]  ;;  %738 = vrot.lane.b32.xlu0 %v734_v26, %s1205_s25 }
 0x2ce   : > { %732 = vst.msk [vmem:[#allocation3] sm:$0xff] %vm359_vm0, %v730_v27  ;;  %v746_v31 = vld [vmem:[#allocation2 + $0x2] sm:$0xff] }
 0x2d0   : > { %v735_v32 = vld [vmem:[#allocation2 + $0x9] sm:$0xff] }
 0x2d1   : > { %750 = vrot.lane.b32.xlu0 %v746_v31, %s1209_s12  ;;  %740 = vrot.lane.b32.xlu1 %v735_v32, %s1205_s25  ;;  %v770_v33 = vld [vmem:[#allocation2 + $0x4] sm:$0xff]  ;;  %v771_v34 = vld [vmem:[#allocation2 + $0xc] sm:$0xff]  ;;  %s350_s25 = sand.u32 1, %s1194_s14  }
 0x2d2   : > { %772 = vst.msk [vmem:[#allocation3 + $0x8] sm:$0xff] %vm359_vm0, %v770_v33  ;;  %773 = vst.msk [vmem:[#allocation3 + $0x18] sm:$0xff] %vm359_vm0, %v771_v34  ;;  %v731_v35 = vld [vmem:[#allocation2 + $0x8] sm:$0xff]  ;;  %s1004_s30 = sshll.u32 %s350_s25, 4 }
 0x2d3   : > { %733 = vst.msk [vmem:[#allocation3 + $0x10] sm:$0xff] %vm359_vm0, %v731_v35  ;;  %v758_v36 = vld [vmem:[#allocation2 + $0x3] sm:$0xff]  ;;  %v759_v30 = vld [vmem:[#allocation2 + $0xb] sm:$0xff]  ;;  %s352_s20 = scalar_lea.vmem [#allocation4], %s1004_s30  ;;  %s1212_s30 = smov [#allocation4]  }
 0x2d4   : > { %v747_v37 = vld [vmem:[#allocation2 + $0xa] sm:$0xff]  ;;  %s938_s21 = sshll.u32 %s352_s20, 4  ;;  %s1146_s11 = sshll.u32 %s1212_s30, 4  ;;  %s1492_s21 = int_to_ptr.vmem [resolvable:$true] %s938_s21  ;;  %s1147_s11 = int_to_ptr.vmem [resolvable:$false] %s1146_s11 }
 0x2d5   : > { %762 = vrot.lane.b32.xlu0 %v758_v36, %s1211_s29  ;;  %752 = vrot.lane.b32.xlu1 %v747_v37, %s1209_s12  ;;  %s1490_s12 = scalar_lea.hbm %s1545_s10, %s1047_s26  ;;  %s1142_s17 = scalar_lea.vmem %s1492_s21, 256 }
 0x2d6   : > { %p1143_p11 = scmp.ne.s32.totalorder %s1492_s21, %s1142_s17  ;;  %s1148_s18 = scalar_lea.vmem %s1147_s11, 512 }
 0x2d7   : > { %p1149_p0 = scmp.lt.s32.totalorder %s1492_s21, %s1147_s11  ;;  %p1150_p1 = scmp.lt.s32.totalorder %s1148_s18, %s1142_s17 }
 0x2d8   : > { %p1144_p12 = pnand %p1143_p11, %p1308_p5 }
 0x2d9   : > { %764 = vrot.lane.b32.xlu1 %v759_v30, %s1211_s29  ;;  %v775_v38 = vld [vmem:[#allocation3 + $0x8] sm:$0xff]  ;;  %v777_v39 = vld [vmem:[#allocation3 + $0x18] sm:$0xff]  ;;  %s1495_s29 = scalar_lea.sflag [#allocation5], %s350_s25  ;;  %p1151_p2 = por %p1150_p1, %p1149_p0 }
 0x2da   : > { %v779_v40 = vpack.c.bf16 %v777_v39, %v775_v38  ;;  %p1145_p13 = pneg %p1144_p12 }
 0x2dc   : > { %1038 = vmatprep.mubr.msk.bf16.mxu0 %vm359_vm0, %v779_v40  ;;  %p1152_p3 = pnand %p1151_p2, %p1145_p13 }
 0x33f   : > { %v739_v41 = vpop.permute.xlu0 %738 }
 0x340   : > { %744 = vst.msk [vmem:[#allocation3] sm:$0xff] %vm547_vm9, %v739_v41 }
 0x343   : > { %v751_v42 = vpop.permute.xlu0 %750  ;;  %v741_v43 = vpop.permute.xlu1 %740 }
 0x344   : > { %756 = vst.msk [vmem:[#allocation3] sm:$0xff] %vm560_vm10, %v751_v42 }
 0x345   : > { %745 = vst.msk [vmem:[#allocation3 + $0x10] sm:$0xff] %vm547_vm9, %v741_v43 }
 0x347   : > { %v763_v44 = vpop.permute.xlu0 %762  ;;  %v753_v45 = vpop.permute.xlu1 %752 }
 0x348   : > { %768 = vst.msk [vmem:[#allocation3] sm:$0xff] %vm573_vm11, %v763_v44 }
 0x349   : > { %757 = vst.msk [vmem:[#allocation3 + $0x10] sm:$0xff] %vm560_vm10, %v753_v45 }
 0x34b   : > { %v765_v46 = vpop.permute.xlu1 %764 }
 0x34c   : > { %769 = vst.msk [vmem:[#allocation3 + $0x10] sm:$0xff] %vm573_vm11, %v765_v46 }
 0x34f   : > { %v774_v47 = vld [vmem:[#allocation3] sm:$0xff] }
 0x353   : > { %v776_v48 = vld [vmem:[#allocation3 + $0x10] sm:$0xff] }
 0x354   : > { %v778_v49 = vpack.c.bf16 %v776_v48, %v774_v47 }
 0x356   : > { %896 = vmatmul.mubr.bf16.vlgmr.msra.gmra.mxu0 %v778_v49 }
 0x416   : > { %v897_v51 = vpop.f32.mrf.mxu0 }
 0x417   : > { %v911_v53 = vmul.f32 %v1039_v50, %v897_v51 }
 0x418   : > { %v899_v54 = vpop.f32.mrf.mxu0 }
 0x419   : > { %v920_v55 = vadd.f32 %v1040_v52, %v911_v53 }
 0x41a   : > { %v900_v56 = vpop.f32.mrf.mxu0 }
 0x41b   : > { %922 = vst.msk [vmem:[%s352_s20] sm:$0xff] %vm359_vm0, %v920_v55  ;;  %v912_v57 = vmul.f32 %v1039_v50, %v900_v56 }
 0x41c   : > { %v902_v58 = vpop.f32.mrf.mxu0 }
 0x41d   : > { %v921_v59 = vadd.f32 %v1040_v52, %v912_v57 }
 0x41f   : > { %923 = vst.msk [vmem:[%s352_s20 + $0x8] sm:$0xff] %vm359_vm0, %v921_v59 }
 0x420   : > { %1155 = shalt.err (!%p1152_p3)
}
 0x421   : > { %s1156_s25 = scalar_lea.hbm %s1490_s12, 256  ;;  %s1160_s27 = scalar_lea.hbm %s1545_s10, 512 }
 0x422   : > { %p1157_p4 = scmp.ne.s32.totalorder %s1490_s12, %s1156_s25  ;;  %p1161_p9 = scmp.lt.s32.totalorder %s1490_s12, %s1545_s10 }
 0x423   : > { %p1162_p10 = scmp.lt.s32.totalorder %s1160_s27, %s1156_s25 }
 0x424   : > { %p1158_p7 = pnand %p1157_p4, %p1308_p5 }
 0x425   : > { %p1163_p11 = por %p1162_p10, %p1161_p9 }
 0x426   : > { %p1159_p8 = pneg %p1158_p7 }
 0x428   : > { %p1164_p12 = pnand %p1163_p11, %p1159_p8 }
 0x42a   : > { %1167 = shalt.err (!%p1164_p12)
}
 0x42b   : > { %s1213_s17 = smov 128   ;;  %s1214_s11 = smov 8  }
 0x42c   : > { %1068 = dma.vmem_to_hbm [thread:$0]  (%p1308_p5), %s1492_s21, 256, %s1490_s12, %s1495_s29, %s1213_s17, %s1213_s17, %s1214_s11  }
 0x42d PF: > { %p1074_p13 = scmp.ge.s32.totalorder %s1202_s16, 2  ;;  %s953_s18 = sand.u32 1, %s1190_s13  }
 0x42e   : > { %s954_s25 = scalar_lea.sflag [#allocation5], %s953_s18 }
 0x42f   : > { %p1071_p0 = pnand %p1074_p13, %p1312_p6 }
 0x431   : > { %p1072_p1 = pneg %p1071_p0 }
 0x433   : > { %1185 = dma.done.wait (%p1072_p1), %s954_s25, 256  }
 0x434   : > { %1187 = vsyncadd (%p1072_p1), %s954_s25, 4294967040  ;;  %p20_p2 = scmp.ge.s32.totalorder %s1295_s19, 4   ;;  %s1548_s13 = smov %s1194_s14 }
 0x435   : > { %s1549_s14 = smov %s1198_s15  ;;  %s1550_s15 = smov %s1306_s22 }
 0x436   : > { %s1551_s16 = smov %s1295_s19  ;;  %22 = sbr.rel (!%p20_p2) target bundleno = 3 (0x3), region = 95 }
 0x43b   :  { %959 = vsyncpa [#allocation5], 1 }
 0x43c   :  { %961 = vsyncpa [#allocation5 + $0x1], 1 }

</bundles_post_ra>
